<compile_context>
chip_gen: v7x
topology: tpu7x:2x2x1
jax: 0.10.0
libtpu: 0.0.40
codegen_flags: <defaults>
</compile_context>

<pallas_src>
import functools

import jax
import jax.numpy as jnp
from jax.experimental import pallas as pl
from jax.experimental.pallas import tpu as pltpu


_ROW_QUANTUM = 1024     # original rows per tile quantum (=> packed rows stay 8/128 aligned)
_MAX_TILE_ROWS = 16384  # ~10-14 MiB of VMEM/tile incl. the f32 (tbp, P*H) h1/h2 temporaries


def _round_up(x: int, m: int) -> int:
    return ((x + m - 1) // m) * m


def _pack_factor(din: int, hidden: int) -> int:
    """Batch rows packed per vreg row; fill the 128-lane vreg with the narrow Din."""
    for p in (8, 4, 2):
        if p * din <= 128 and p * hidden <= 512:
            return p
    return 1


def _choose_tiling(batch: int) -> tuple[int, int]:
    """(tile_rows, num_tiles) in original-row units.

    tile_rows is a multiple of _ROW_QUANTUM and capped at _MAX_TILE_ROWS (the
    VMEM budget is dominated by the f32 h1/h2 temporaries, not the state tile).
    num_tiles is kept even whenever the batch exceeds one quantum so the
    "parallel" grid axis splits evenly across v7x's two TensorCores and the
    state DMA stays pipelined behind compute.
    """
    b = _round_up(max(batch, 1), _ROW_QUANTUM)
    if b <= _ROW_QUANTUM:
        return _ROW_QUANTUM, 1
    nt = pl.cdiv(b, _MAX_TILE_ROWS)
    if nt % 2:
        nt += 1
    tb = _round_up(pl.cdiv(b, nt), _ROW_QUANTUM)
    return tb, nt


def _block_diag(w, p: int):
    """(din, dout) -> (p*din, p*dout) block-diagonal replication of w."""
    if p == 1:
        return w
    din, dout = w.shape
    out = jnp.zeros((p * din, p * dout), w.dtype)
    for k in range(p):
        out = out.at[k * din:(k + 1) * din, k * dout:(k + 1) * dout].set(w)
    return out


def _supports_bf16_eup() -> bool:
    """v6e / v7x have a packed bf16 VPU/EUP path; v5e and older do not."""
    try:
        kind = jax.devices()[0].device_kind.lower()
    except Exception:
        return False
    return any(tag in kind for tag in ("v6", "v7", "tpu7"))


def _mlp_kernel(x_ref, w1_ref, b1_ref, w2_ref, b2_ref, w3_ref, b3_ref, o_ref,
                *, tanh_dtype):
    """Fused, lane-packed 3-layer MLP for one (tbp, P*Din) batch tile."""
    x = x_ref[...]                                               # (tbp, P*Din)
    z1 = jnp.dot(x, w1_ref[...], preferred_element_type=jnp.float32) + b1_ref[...]
    h1 = jnp.tanh(z1.astype(tanh_dtype)).astype(w2_ref.dtype)    # (tbp, P*H)
    z2 = jnp.dot(h1, w2_ref[...], preferred_element_type=jnp.float32) + b2_ref[...]
    h2 = jnp.tanh(z2.astype(tanh_dtype)).astype(jnp.float32)     # (tbp, P*H)
    # Final Linear(H -> 1) for all P packed slots at once: contract P*H of the
    # (P, P*H) block-diagonal w3 row-bank against P*H of h2 (the flash-attention
    # q @ k^T pattern).  Result is lane-major (P, tbp) -> lane-dense stores,
    # a thin-M (M=P) MXU pass, and no XLU transpose / relayout of h2.
    val = jax.lax.dot_general(
        w3_ref[...], h2,
        dimension_numbers=(((1,), (1,)), ((), ())),
        preferred_element_type=jnp.float32,
    ) + b3_ref[0, 0]                                             # (P, tbp)
    o_ref[0] = val.astype(o_ref.dtype)                           # o_ref: (1, P, tbp)


@functools.partial(jax.jit,
                   static_argnames=("batch_tile", "compute_dtype", "tanh_dtype"))
def value_function_forward(state, goal, params, *, batch_tile=None,
                           compute_dtype=jnp.bfloat16, tanh_dtype=None):
    """Pallas implementation of ValueFunctionModel.forward(state, goal) -> (B,).

    compute_dtype applies only to the streamed state and W1/W2 (bf16 halves the
    per-row HBM traffic but slightly perturbs the model; pass jnp.float32 for a
    bit-faithful f32 path).  Accumulation, biases and w3 are always f32.
    tanh_dtype=None auto-selects bf16 only on v6e/v7x (bf16 EUP) when
    compute_dtype is bf16, else f32 (v5e-safe).
    """
    del goal  # unused by the reference module's forward pass
    w1, b1, w2, b2, w3, b3 = params
    B, Din = state.shape
    H = w1.shape[1]
    compute_dtype = jnp.dtype(compute_dtype)
    if tanh_dtype is None:
        tanh_dtype = (jnp.bfloat16
                      if (compute_dtype == jnp.dtype(jnp.bfloat16) and _supports_bf16_eup())
                      else jnp.float32)
    tanh_dtype = jnp.dtype(tanh_dtype)

    P = _pack_factor(Din, H)

    if batch_tile is not None:
        tb = _round_up(max(int(batch_tile), _ROW_QUANTUM), _ROW_QUANTUM)
        nt = pl.cdiv(_round_up(B, _ROW_QUANTUM), tb)
    else:
        tb, nt = _choose_tiling(B)
    B_pad = nt * tb
    tbp = tb // P                      # packed rows per tile (multiple of 128)

    # --- wrapper-side packing: P batch rows per vreg row, block-diagonal weights ---
    x = state.astype(compute_dtype)
    if B_pad != B:
        x = jnp.pad(x, ((0, B_pad - B), (0, 0)))
    x = x.reshape(B_pad // P, P * Din)                           # (B_pad/P, P*Din)

    w1p = _block_diag(w1.astype(compute_dtype), P)               # (P*Din, P*H)
    w2p = _block_diag(w2.astype(compute_dtype), P)               # (P*H,  P*H)
    w3p = _block_diag(w3.reshape(1, H).astype(jnp.float32), P)   # (P,    P*H)
    b1p = jnp.tile(b1.reshape(1, H).astype(jnp.float32), (1, P)) # (1,    P*H)
    b2p = jnp.tile(b2.reshape(1, H).astype(jnp.float32), (1, P)) # (1,    P*H)
    b3f = b3.reshape(1, 1).astype(jnp.float32)                   # scalar in SMEM

    kernel = functools.partial(_mlp_kernel, tanh_dtype=tanh_dtype)
    out = pl.pallas_call(
        kernel,
        out_shape=jax.ShapeDtypeStruct((nt, P, tbp), jnp.float32),
        grid_spec=pltpu.PrefetchScalarGridSpec(
            num_scalar_prefetch=0,
            grid=(nt,),
            in_specs=[
                pl.BlockSpec((tbp, P * Din), lambda i: (i, 0)),    # packed state (pipelined)
                pl.BlockSpec((P * Din, P * H), lambda i: (0, 0)),  # W1' (resident)
                pl.BlockSpec((1, P * H), lambda i: (0, 0)),        # b1 tiled
                pl.BlockSpec((P * H, P * H), lambda i: (0, 0)),    # W2'
                pl.BlockSpec((1, P * H), lambda i: (0, 0)),        # b2 tiled
                pl.BlockSpec((P, P * H), lambda i: (0, 0)),        # w3 row-bank
                pl.BlockSpec(memory_space=pltpu.MemorySpace.SMEM), # b3 scalar
            ],
            out_specs=pl.BlockSpec((1, P, tbp), lambda i: (i, 0, 0)),
        ),
        compiler_params=pltpu.CompilerParams(
            dimension_semantics=("parallel",),     # megacore-shardable batch axis
            vmem_limit_bytes=32 * 1024 * 1024,     # headroom above v5e's 16 MiB default
        ),
    )(x, w1p, b1p, w2p, b2p, w3p, b3f)

    # De-interleave: out[i, k, j] is the value of original row i*tb + P*j + k.
    vals = jnp.transpose(out, (0, 2, 1)).reshape(B_pad)
    return vals[:B]


def init_value_function_params(key, latent_space_dim, hidden_dim=None, num_layers=2):
    """Deterministic PyTorch-Linear-style init (uniform +/- 1/sqrt(fan_in))."""
    assert num_layers == 2, "kernel is specialized to the default num_layers=2"
    hidden_dim = hidden_dim or latent_space_dim * 3
    last_dim = latent_space_dim * 2

    def linear(key, fan_in, fan_out):
        kw, kb = jax.random.split(key)
        bound = 1.0 / jnp.sqrt(fan_in)
        w = jax.random.uniform(kw, (fan_in, fan_out), jnp.float32, -bound, bound)
        b = jax.random.uniform(kb, (1, fan_out), jnp.float32, -bound, bound)
        return w, b

    k1, k2, k3 = jax.random.split(key, 3)
    w1, b1 = linear(k1, last_dim, hidden_dim)
    w2, b2 = linear(k2, hidden_dim, hidden_dim)
    w3, b3 = linear(k3, hidden_dim, 1)
    return (w1, b1, w2, b2, w3, b3)


def _reference_forward(state, params):
    w1, b1, w2, b2, w3, b3 = params
    h1 = jnp.tanh(state @ w1 + b1)
    h2 = jnp.tanh(h1 @ w2 + b2)
    return (h2 @ w3 + b3).squeeze(-1)


if __name__ == "__main__":
    latent_space_dim = 16          # -> input dim 2*L = 32, hidden = 48

    key = jax.random.PRNGKey(0)
    k_params, k_state, k_goal = jax.random.split(key, 3)
    params = init_value_function_params(k_params, latent_space_dim)

    # 1) Tiny batch, single tile, f32 path (strict check of packing / padding /
    #    de-interleave against the reference).
    B0 = 8
    state = jax.random.normal(k_state, (B0, 2 * latent_space_dim), jnp.float32)
    goal = jax.random.normal(k_goal, (B0, 2 * latent_space_dim), jnp.float32)
    out = jax.block_until_ready(
        value_function_forward(state, goal, params,
                               compute_dtype=jnp.float32, tanh_dtype=jnp.float32))
    ref = _reference_forward(state, params)
    assert out.shape == (B0,)
    assert jnp.allclose(out, ref, atol=3e-5, rtol=3e-5)

    # 2) Multi-step grid + non-divisible batch (padding, pipelining, parallel axis),
    #    still on the strict f32 path.
    B1 = 2500
    state1 = jax.random.normal(jax.random.PRNGKey(1),
                               (B1, 2 * latent_space_dim), jnp.float32)
    out1 = jax.block_until_ready(
        value_function_forward(state1, state1, params, batch_tile=1024,
                               compute_dtype=jnp.float32, tanh_dtype=jnp.float32))
    ref1 = _reference_forward(state1, params)
    assert out1.shape == (B1,)
    assert jnp.allclose(out1, ref1, atol=3e-5, rtol=3e-5)

    # 3) Default path: bf16 streamed state + bf16 W1'/W2' (and bf16 tanh on
    #    v6e/v7x).  Looser tolerance since the bf16 weights slightly perturb the
    #    model (documented correctness concern).
    B2 = 4096
    state2 = jax.random.normal(jax.random.PRNGKey(2),
                               (B2, 2 * latent_space_dim), jnp.float32)
    out2 = jax.block_until_ready(value_function_forward(state2, state2, params))
    ref2 = _reference_forward(state2, params)
    assert out2.shape == (B2,)
    assert jnp.allclose(out2, ref2, atol=5e-2, rtol=5e-2)

    print("KERNEL_OK")
</pallas_src>

<mosaic_0001>
module attributes {stable_mosaic.version = 11 : i64} {
  func.func @_mlp_kernel(%arg0: i32, %arg1: memref<256x128xf32, #tpu.memory_space<vmem>>, %arg2: memref<128x192xf32, #tpu.memory_space<vmem>>, %arg3: memref<1x192xf32, #tpu.memory_space<vmem>>, %arg4: memref<192x192xf32, #tpu.memory_space<vmem>>, %arg5: memref<1x192xf32, #tpu.memory_space<vmem>>, %arg6: memref<4x192xf32, #tpu.memory_space<vmem>>, %arg7: memref<1x1xf32, #tpu.memory_space<smem>>, %arg8: memref<1x4x256xf32, #tpu.memory_space<vmem>>) attributes {dimension_semantics = [#tpu.dimension_semantics<parallel>], iteration_bounds = array<i64: 1>, scalar_prefetch = 0 : i64, scratch_operands = 0 : i64, tpu.core_type = #tpu.core_type<tc>, window_params = [{transform_indices = @transform_0, window_bounds = array<i64: 256, 128>}, {pipeline_mode = #tpu.pipeline_mode<synchronous>, transform_indices = @transform_1, window_bounds = array<i64: 128, 192>}, {pipeline_mode = #tpu.pipeline_mode<synchronous>, transform_indices = @transform_2, window_bounds = array<i64: 1, 192>}, {pipeline_mode = #tpu.pipeline_mode<synchronous>, transform_indices = @transform_3, window_bounds = array<i64: 192, 192>}, {pipeline_mode = #tpu.pipeline_mode<synchronous>, transform_indices = @transform_4, window_bounds = array<i64: 1, 192>}, {pipeline_mode = #tpu.pipeline_mode<synchronous>, transform_indices = @transform_5, window_bounds = array<i64: 4, 192>}, {transform_indices = @transform_6, window_bounds = array<i64: 1, 1>}, {transform_indices = @transform_7, window_bounds = array<i64: 1, 4, 256>}]} {
    %c0 = arith.constant 0 : index
    %c0_0 = arith.constant 0 : index
    %0 = vector.load %arg1[%c0, %c0_0] : memref<256x128xf32, #tpu.memory_space<vmem>>, vector<256x128xf32>
    %c0_1 = arith.constant 0 : index
    %c0_2 = arith.constant 0 : index
    %1 = vector.load %arg2[%c0_1, %c0_2] : memref<128x192xf32, #tpu.memory_space<vmem>>, vector<128x192xf32>
    %cst = arith.constant dense<0.000000e+00> : vector<256x192xf32>
    %2 = tpu.matmul %0, %1, %cst {dimension_numbers = #tpu.dot_dimension_numbers<[1], [0], [0], [1], [0, 0, 1, 1], [], []>} : vector<256x128xf32>, vector<128x192xf32>, vector<256x192xf32> -> vector<256x192xf32>
    %c0_3 = arith.constant 0 : index
    %c0_4 = arith.constant 0 : index
    %3 = vector.load %arg3[%c0_3, %c0_4] : memref<1x192xf32, #tpu.memory_space<vmem>>, vector<1x192xf32>
    %4 = vector.broadcast %3 : vector<1x192xf32> to vector<256x192xf32>
    %5 = arith.addf %2, %4 : vector<256x192xf32>
    %6 = math.tanh %5 : vector<256x192xf32>
    %c0_5 = arith.constant 0 : index
    %c0_6 = arith.constant 0 : index
    %7 = vector.load %arg4[%c0_5, %c0_6] : memref<192x192xf32, #tpu.memory_space<vmem>>, vector<192x192xf32>
    %cst_7 = arith.constant dense<0.000000e+00> : vector<256x192xf32>
    %8 = tpu.matmul %6, %7, %cst_7 {dimension_numbers = #tpu.dot_dimension_numbers<[1], [0], [0], [1], [0, 0, 1, 1], [], []>} : vector<256x192xf32>, vector<192x192xf32>, vector<256x192xf32> -> vector<256x192xf32>
    %c0_8 = arith.constant 0 : index
    %c0_9 = arith.constant 0 : index
    %9 = vector.load %arg5[%c0_8, %c0_9] : memref<1x192xf32, #tpu.memory_space<vmem>>, vector<1x192xf32>
    %10 = vector.broadcast %9 : vector<1x192xf32> to vector<256x192xf32>
    %11 = arith.addf %8, %10 : vector<256x192xf32>
    %12 = math.tanh %11 : vector<256x192xf32>
    %c0_10 = arith.constant 0 : index
    %c0_11 = arith.constant 0 : index
    %13 = vector.load %arg6[%c0_10, %c0_11] : memref<4x192xf32, #tpu.memory_space<vmem>>, vector<4x192xf32>
    %cst_12 = arith.constant dense<0.000000e+00> : vector<4x256xf32>
    %14 = tpu.matmul %13, %12, %cst_12 {dimension_numbers = #tpu.dot_dimension_numbers<[1], [1], [0], [0], [0, 0, 1, 0], [], []>} : vector<4x192xf32>, vector<256x192xf32>, vector<4x256xf32> -> vector<4x256xf32>
    %c0_13 = arith.constant 0 : index
    %c0_14 = arith.constant 0 : index
    %15 = memref.load %arg7[%c0_13, %c0_14] : memref<1x1xf32, #tpu.memory_space<smem>>
    %16 = vector.broadcast %15 : f32 to vector<4x256xf32>
    %17 = arith.addf %14, %16 : vector<4x256xf32>
    %c0_15 = arith.constant 0 : index
    %c0_16 = arith.constant 0 : index
    %c0_17 = arith.constant 0 : index
    %18 = vector.load %arg8[%c0_15, %c0_16, %c0_17] : memref<1x4x256xf32, #tpu.memory_space<vmem>>, vector<1x4x256xf32>
    %19 = vector.shape_cast %18 : vector<1x4x256xf32> to vector<4x256xf32>
    %20 = vector.shape_cast %17 : vector<4x256xf32> to vector<1x4x256xf32>
    tpu.vector_store %arg8[%c0_15, %c0_16, %c0_17], %20 {strides = array<i32>} : memref<1x4x256xf32, #tpu.memory_space<vmem>>, vector<1x4x256xf32>,
    return
  }
  func.func @transform_0(%arg0: i32) -> (i32, i32) {
    %c0_i32 = arith.constant 0 : i32
    %c0_i32_0 = arith.constant 0 : i32
    return %arg0, %c0_i32 : i32, i32
  }
  func.func @transform_1(%arg0: i32) -> (i32, i32) {
    %c0_i32 = arith.constant 0 : i32
    %c0_i32_0 = arith.constant 0 : i32
    %c0_i32_1 = arith.constant 0 : i32
    return %c0_i32, %c0_i32_0 : i32, i32
  }
  func.func @transform_2(%arg0: i32) -> (i32, i32) {
    %c0_i32 = arith.constant 0 : i32
    %c0_i32_0 = arith.constant 0 : i32
    %c0_i32_1 = arith.constant 0 : i32
    return %c0_i32, %c0_i32_0 : i32, i32
  }
  func.func @transform_3(%arg0: i32) -> (i32, i32) {
    %c0_i32 = arith.constant 0 : i32
    %c0_i32_0 = arith.constant 0 : i32
    %c0_i32_1 = arith.constant 0 : i32
    return %c0_i32, %c0_i32_0 : i32, i32
  }
  func.func @transform_4(%arg0: i32) -> (i32, i32) {
    %c0_i32 = arith.constant 0 : i32
    %c0_i32_0 = arith.constant 0 : i32
    %c0_i32_1 = arith.constant 0 : i32
    return %c0_i32, %c0_i32_0 : i32, i32
  }
  func.func @transform_5(%arg0: i32) -> (i32, i32) {
    %c0_i32 = arith.constant 0 : i32
    %c0_i32_0 = arith.constant 0 : i32
    %c0_i32_1 = arith.constant 0 : i32
    return %c0_i32, %c0_i32_0 : i32, i32
  }
  func.func @transform_6(%arg0: i32) -> (i32, i32) {
    %c0_i32 = arith.constant 0 : i32
    %c0_i32_0 = arith.constant 0 : i32
    %c0_i32_1 = arith.constant 0 : i32
    return %c0_i32, %c0_i32_0 : i32, i32
  }
  func.func @transform_7(%arg0: i32) -> (i32, i32, i32) {
    %c0_i32 = arith.constant 0 : i32
    %c0_i32_0 = arith.constant 0 : i32
    %c0_i32_1 = arith.constant 0 : i32
    return %arg0, %c0_i32, %c0_i32_0 : i32, i32, i32
  }
}

</mosaic_0001>

<bundles_post_ra>
// kernel: value_function_forward.1
= control target key start
LH: loop header
LB: loop body
LE: loop exit
PB: predicated region body
PF: predicated region fallthrough
CT: control target
= control target key end

     0   :  { %v1568_v3 = vmov 0.0   ;;  %vm484_vm0 = vcmask 523264   ;;  %s2216_s1 = inlined_call_operand.vmem [shape: f32[128,192], index: 1, kind: input, shape index: {}]   ;;  %s2217_s0 = inlined_call_operand.vmem [shape: f32[256,128], index: 0, kind: input, shape index: {}]   ;;  %s2218_s3 = inlined_call_operand.vmem [shape: f32[192,192], index: 3, kind: input, shape index: {}]   ;;  %s2219_s2 = inlined_call_operand.vmem [shape: f32[1,192], index: 2, kind: input, shape index: {}]   ;;  %s2220_s4 = inlined_call_operand.vmem [shape: f32[1,192], index: 4, kind: input, shape index: {}]   ;;  %s2221_s5 = inlined_call_operand.vmem [shape: f32[4,192], index: 5, kind: input, shape index: {}]   ;;  %s2222_s6 = inlined_call_operand.<no memory space> [shape: f32[1,1], index: 6, kind: input, shape index: {}]   ;;  %s2223_s7 = inlined_call_operand.vmem [shape: f32[1,4,256], index: 7, kind: output, shape index: {}]  }
   0x1   :  { %v60_v0 = vld [vmem:[%s2216_s1 + $0x8] sm:$0xff]  ;;  %v62_v1 = vld [vmem:[%s2216_s1 + $0x18] sm:$0xff]  ;;  %v59_v2 = vld [vmem:[%s2216_s1] sm:$0xff]  ;;  %167 = vmatprep.mubr.f32.mxu0 %v1568_v3 }
   0x2   :  { %v1150_v4 = vpack.c.bf16 %v62_v1, %v60_v0  ;;  %v61_v5 = vld [vmem:[%s2216_s1 + $0x10] sm:$0xff]  ;;  %v64_v6 = vld [vmem:[%s2216_s1 + $0x28] sm:$0xff]  ;;  %v66_v7 = vld [vmem:[%s2216_s1 + $0x38] sm:$0xff] }
   0x3   :  { %v1152_v8 = vpack.c.bf16 %v61_v5, %v59_v2  ;;  %v1154_v9 = vpack.c.bf16 %v66_v7, %v64_v6  ;;  %v63_v10 = vld [vmem:[%s2216_s1 + $0x20] sm:$0xff]  ;;  %v65_v11 = vld [vmem:[%s2216_s1 + $0x30] sm:$0xff]  ;;  %v68_v12 = vld [vmem:[%s2216_s1 + $0x48] sm:$0xff] }
   0x4   :  { %1151 = vmatprep.subr.bf16.mxu0 %v1150_v4  ;;  %v70_v13 = vld [vmem:[%s2216_s1 + $0x58] sm:$0xff]  ;;  %v1156_v14 = vpack.c.bf16 %v65_v11, %v63_v10  ;;  %v67_v16 = vld [vmem:[%s2216_s1 + $0x40] sm:$0xff]  ;;  %v69_v17 = vld [vmem:[%s2216_s1 + $0x50] sm:$0xff] }
   0x5   :  { %1153 = vmatpush1.bf16.msra.mxu0 %v1152_v8  ;;  %v1158_v15 = vpack.c.bf16 %v70_v13, %v68_v12  ;;  %v72_v18 = vld [vmem:[%s2216_s1 + $0x68] sm:$0xff]  ;;  %v74_v19 = vld [vmem:[%s2216_s1 + $0x78] sm:$0xff]  ;;  %v1160_v20 = vpack.c.bf16 %v69_v17, %v67_v16  ;;  %v71_v22 = vld [vmem:[%s2216_s1 + $0x60] sm:$0xff] }
   0x6   :  { %1155 = vmatprep.subr.bf16.mxu0 %v1154_v9  ;;  %v1162_v21 = vpack.c.bf16 %v74_v19, %v72_v18  ;;  %v73_v23 = vld [vmem:[%s2216_s1 + $0x70] sm:$0xff]  ;;  %v76_v24 = vld [vmem:[%s2216_s1 + $0x88] sm:$0xff]  ;;  %v78_v25 = vld [vmem:[%s2216_s1 + $0x98] sm:$0xff] }
   0x7   :  { %v1164_v26 = vpack.c.bf16 %v73_v23, %v71_v22  ;;  %v1166_v27 = vpack.c.bf16 %v78_v25, %v76_v24  ;;  %v75_v28 = vld [vmem:[%s2216_s1 + $0x80] sm:$0xff]  ;;  %v77_v29 = vld [vmem:[%s2216_s1 + $0x90] sm:$0xff]  ;;  %v80_v30 = vld [vmem:[%s2216_s1 + $0xa8] sm:$0xff] }
   0x8   :  { %v82_v31 = vld [vmem:[%s2216_s1 + $0xb8] sm:$0xff]  ;;  %v1168_v32 = vpack.c.bf16 %v77_v29, %v75_v28  ;;  %v79_v34 = vld [vmem:[%s2216_s1 + $0xa0] sm:$0xff]  ;;  %v81_v35 = vld [vmem:[%s2216_s1 + $0xb0] sm:$0xff] }
   0x9   :  { %1157 = vmatpush1.bf16.msra.mxu0 %v1156_v14  ;;  %v1170_v33 = vpack.c.bf16 %v82_v31, %v80_v30  ;;  %v84_v36 = vld [vmem:[%s2216_s1 + $0xc8] sm:$0xff]  ;;  %v86_v37 = vld [vmem:[%s2216_s1 + $0xd8] sm:$0xff]  ;;  %v1172_v38 = vpack.c.bf16 %v81_v35, %v79_v34  ;;  %v83_v40 = vld [vmem:[%s2216_s1 + $0xc0] sm:$0xff] }
   0xa   :  { %1159 = vmatprep.subr.bf16.mxu0 %v1158_v15  ;;  %v1174_v39 = vpack.c.bf16 %v86_v37, %v84_v36  ;;  %v85_v41 = vld [vmem:[%s2216_s1 + $0xd0] sm:$0xff]  ;;  %v88_v42 = vld [vmem:[%s2216_s1 + $0xe8] sm:$0xff]  ;;  %v90_v43 = vld [vmem:[%s2216_s1 + $0xf8] sm:$0xff] }
   0xb   :  { %v1176_v44 = vpack.c.bf16 %v85_v41, %v83_v40  ;;  %v1178_v45 = vpack.c.bf16 %v90_v43, %v88_v42  ;;  %v87_v46 = vld [vmem:[%s2216_s1 + $0xe0] sm:$0xff]  ;;  %v89_v47 = vld [vmem:[%s2216_s1 + $0xf0] sm:$0xff]  ;;  %v425_v50 = vld [vmem:[%s2218_s3 + $0x8] sm:$0xff] }
   0xc   :  { %v1180_v48 = vpack.c.bf16 %v89_v47, %v87_v46  ;;  %v27_v49 = vld [vmem:[%s2217_s0] sm:$0xff]  ;;  %v427_v51 = vld [vmem:[%s2218_s3 + $0x18] sm:$0xff]  ;;  %v426_v54 = vld [vmem:[%s2218_s3 + $0x10] sm:$0xff] }
   0xd   :  { %1161 = vmatpush1.bf16.msra.mxu0 %v1160_v20  ;;  %v424_v52 = vld [vmem:[%s2218_s3] sm:$0xff]  ;;  %v1182_v53 = vpack.c.bf16 %v427_v51, %v425_v50  ;;  %v429_v55 = vld [vmem:[%s2218_s3 + $0x28] sm:$0xff]  ;;  %v431_v56 = vld [vmem:[%s2218_s3 + $0x38] sm:$0xff] }
   0xe   :  { %1163 = vmatprep.subr.bf16.mxu0 %v1162_v21  ;;  %v1184_v57 = vpack.c.bf16 %v426_v54, %v424_v52  ;;  %v1186_v58 = vpack.c.bf16 %v431_v56, %v429_v55  ;;  %v428_v59 = vld [vmem:[%s2218_s3 + $0x20] sm:$0xff]  ;;  %v430_v60 = vld [vmem:[%s2218_s3 + $0x30] sm:$0xff]  ;;  %v433_v61 = vld [vmem:[%s2218_s3 + $0x48] sm:$0xff] }
   0xf   :  { %1183 = vmatprep.subr.bf16.mxu1 %v1182_v53  ;;  %v435_v62 = vld [vmem:[%s2218_s3 + $0x58] sm:$0xff]  ;;  %v28_v63 = vld [vmem:[%s2217_s0 + $0x8] sm:$0xff]  ;;  %v1188_v0 = vpack.c.bf16 %v430_v60, %v428_v59  ;;  %v432_v2 = vld [vmem:[%s2218_s3 + $0x40] sm:$0xff] }
  0x10   :  { %1185 = vmatpush1.bf16.msra.mxu1 %v1184_v57  ;;  %v1190_v1 = vpack.c.bf16 %v435_v62, %v433_v61  ;;  %v434_v4 = vld [vmem:[%s2218_s3 + $0x50] sm:$0xff]  ;;  %v437_v5 = vld [vmem:[%s2218_s3 + $0x68] sm:$0xff]  ;;  %v439_v6 = vld [vmem:[%s2218_s3 + $0x78] sm:$0xff] }
  0x11   :  { %1165 = vmatpush1.bf16.msra.mxu0 %v1164_v26  ;;  %1187 = vmatprep.subr.bf16.mxu1 %v1186_v58  ;;  %v29_v7 = vld [vmem:[%s2217_s0 + $0x10] sm:$0xff]  ;;  %v1192_v8 = vpack.c.bf16 %v434_v4, %v432_v2  ;;  %v1194_v9 = vpack.c.bf16 %v439_v6, %v437_v5  ;;  %v436_v10 = vld [vmem:[%s2218_s3 + $0x60] sm:$0xff]  ;;  %v441_v12 = vld [vmem:[%s2218_s3 + $0x88] sm:$0xff] }
  0x12   :  { %1167 = vmatprep.subr.bf16.mxu0 %v1166_v27  ;;  %v438_v11 = vld [vmem:[%s2218_s3 + $0x70] sm:$0xff]  ;;  %v443_v13 = vld [vmem:[%s2218_s3 + $0x98] sm:$0xff]  ;;  %v440_v17 = vld [vmem:[%s2218_s3 + $0x80] sm:$0xff] }
  0x13   :  { %v30_v14 = vld [vmem:[%s2217_s0 + $0x18] sm:$0xff]  ;;  %v1196_v15 = vpack.c.bf16 %v438_v11, %v436_v10  ;;  %v1198_v16 = vpack.c.bf16 %v443_v13, %v441_v12  ;;  %v442_v18 = vld [vmem:[%s2218_s3 + $0x90] sm:$0xff]  ;;  %v445_v19 = vld [vmem:[%s2218_s3 + $0xa8] sm:$0xff] }
  0x14   :  { %1189 = vmatpush1.bf16.msra.mxu1 %v1188_v0  ;;  %v447_v20 = vld [vmem:[%s2218_s3 + $0xb8] sm:$0xff]  ;;  %v31_v21 = vld [vmem:[%s2217_s0 + $0x20] sm:$0xff]  ;;  %v1200_v22 = vpack.c.bf16 %v442_v18, %v440_v17  ;;  %v446_v25 = vld [vmem:[%s2218_s3 + $0xb0] sm:$0xff] }
  0x15   :  { %1169 = vmatpush1.bf16.msra.mxu0 %v1168_v32  ;;  %1191 = vmatprep.subr.bf16.mxu1 %v1190_v1  ;;  %v1202_v23 = vpack.c.bf16 %v447_v20, %v445_v19  ;;  %v444_v24 = vld [vmem:[%s2218_s3 + $0xa0] sm:$0xff]  ;;  %v449_v26 = vld [vmem:[%s2218_s3 + $0xc8] sm:$0xff]  ;;  %v451_v27 = vld [vmem:[%s2218_s3 + $0xd8] sm:$0xff] }
  0x16   :  { %1171 = vmatprep.subr.bf16.mxu0 %v1170_v33  ;;  %v32_v28 = vld [vmem:[%s2217_s0 + $0x28] sm:$0xff]  ;;  %v1204_v29 = vpack.c.bf16 %v446_v25, %v444_v24  ;;  %v1206_v30 = vpack.c.bf16 %v451_v27, %v449_v26  ;;  %v448_v31 = vld [vmem:[%s2218_s3 + $0xc0] sm:$0xff]  ;;  %v450_v32 = vld [vmem:[%s2218_s3 + $0xd0] sm:$0xff]  ;;  %v93_v27 = vlaneseq }
  0x17   :  { %v453_v33 = vld [vmem:[%s2218_s3 + $0xe8] sm:$0xff]  ;;  %v455_v34 = vld [vmem:[%s2218_s3 + $0xf8] sm:$0xff]  ;;  %v33_v35 = vld [vmem:[%s2217_s0 + $0x30] sm:$0xff]  ;;  %v1208_v36 = vpack.c.bf16 %v450_v32, %v448_v31 }
  0x18   :  { %1193 = vmatpush1.bf16.msra.mxu1 %v1192_v8  ;;  %v1210_v37 = vpack.c.bf16 %v455_v34, %v453_v33  ;;  %v34_v40 = vld [vmem:[%s2217_s0 + $0x38] sm:$0xff]  ;;  %v35_v42 = vld [vmem:[%s2217_s0 + $0x40] sm:$0xff]  ;;  %v36_v43 = vld [vmem:[%s2217_s0 + $0x48] sm:$0xff] }
  0x19   :  { %1173 = vmatpush1.bf16.msra.mxu0 %v1172_v38  ;;  %1195 = vmatprep.subr.bf16.mxu1 %v1194_v9  ;;  %v452_v38 = vld [vmem:[%s2218_s3 + $0xe0] sm:$0xff]  ;;  %v40_v47 = vld [vmem:[%s2217_s0 + $0x68] sm:$0xff]  ;;  %v45_v52 = vld [vmem:[%s2217_s0 + $0x90] sm:$0xff] }
  0x1a   :  { %1175 = vmatprep.subr.bf16.mxu0 %v1174_v39  ;;  %v454_v39 = vld [vmem:[%s2218_s3 + $0xf0] sm:$0xff]  ;;  %v39_v46 = vld [vmem:[%s2217_s0 + $0x60] sm:$0xff]  ;;  %v44_v51 = vld [vmem:[%s2217_s0 + $0x88] sm:$0xff] }
  0x1b   :  { %v1212_v41 = vpack.c.bf16 %v454_v39, %v452_v38  ;;  %v43_v50 = vld [vmem:[%s2217_s0 + $0x80] sm:$0xff]  ;;  %v46_v53 = vld [vmem:[%s2217_s0 + $0x98] sm:$0xff]  ;;  %v457_v55 = vld [vmem:[%s2218_s3 + $0x108] sm:$0xff] }
  0x1c   :  { %1197 = vmatpush1.bf16.msra.mxu1 %v1196_v15  ;;  %v47_v54 = vld [vmem:[%s2217_s0 + $0xa0] sm:$0xff]  ;;  %v459_v56 = vld [vmem:[%s2218_s3 + $0x118] sm:$0xff]  ;;  %v48_v57 = vld [vmem:[%s2217_s0 + $0xa8] sm:$0xff] }
  0x1d   :  { %1177 = vmatpush1.bf16.msra.mxu0 %v1176_v44  ;;  %1199 = vmatprep.subr.bf16.mxu1 %v1198_v16  ;;  %v37_v44 = vld [vmem:[%s2217_s0 + $0x50] sm:$0xff]  ;;  %v1214_v58 = vpack.c.bf16 %v459_v56, %v457_v55  ;;  %v456_v59 = vld [vmem:[%s2218_s3 + $0x100] sm:$0xff]  ;;  %v461_v62 = vld [vmem:[%s2218_s3 + $0x128] sm:$0xff] }
  0x1e   :  { %1179 = vmatprep.subr.bf16.mxu0 %v1178_v45  ;;  %v38_v45 = vld [vmem:[%s2217_s0 + $0x58] sm:$0xff]  ;;  %v458_v60 = vld [vmem:[%s2218_s3 + $0x110] sm:$0xff]  ;;  %v460_v2 = vld [vmem:[%s2218_s3 + $0x120] sm:$0xff] }
  0x1f   :  { %v1216_v61 = vpack.c.bf16 %v458_v60, %v456_v59  ;;  %v49_v0 = vld [vmem:[%s2217_s0 + $0xb0] sm:$0xff]  ;;  %v465_v6 = vld [vmem:[%s2218_s3 + $0x148] sm:$0xff]  ;;  %v50_v8 = vld [vmem:[%s2217_s0 + $0xb8] sm:$0xff] }
  0x20   :  { %1201 = vmatpush1.bf16.msra.mxu1 %v1200_v22  ;;  %v462_v4 = vld [vmem:[%s2218_s3 + $0x130] sm:$0xff]  ;;  %v464_v10 = vld [vmem:[%s2218_s3 + $0x140] sm:$0xff]  ;;  %v469_v13 = vld [vmem:[%s2218_s3 + $0x168] sm:$0xff] }
  0x21   :  { %1181 = vmatpush1.bf16.msra.mxu0 %v1180_v48  ;;  %1203 = vmatprep.subr.bf16.mxu1 %v1202_v23  ;;  %v41_v48 = vld [vmem:[%s2217_s0 + $0x70] sm:$0xff]  ;;  %v1220_v5 = vpack.c.bf16 %v462_v4, %v460_v2  ;;  %v51_v15 = vld [vmem:[%s2217_s0 + $0xc0] sm:$0xff]  ;;  %v52_v20 = vld [vmem:[%s2217_s0 + $0xc8] sm:$0xff] }
  0x22   :  { %v466_v11 = vld [vmem:[%s2218_s3 + $0x150] sm:$0xff]  ;;  %v468_v17 = vld [vmem:[%s2218_s3 + $0x160] sm:$0xff]  ;;  %v54_v22 = vld [vmem:[%s2217_s0 + $0xd8] sm:$0xff] }
  0x23   :  { %v1224_v12 = vpack.c.bf16 %v466_v11, %v464_v10  ;;  %v470_v18 = vld [vmem:[%s2218_s3 + $0x170] sm:$0xff]  ;;  %v55_v23 = vld [vmem:[%s2217_s0 + $0xe0] sm:$0xff]  ;;  %v56_v24 = vld [vmem:[%s2217_s0 + $0xe8] sm:$0xff] }
  0x24   :  { %168 = vmatmul.mubr.f32.vlgmr.msra.gmra.mrb[0].mxu0 %v27_v49  ;;  %1205 = vmatpush1.bf16.msra.mxu1 %v1204_v29  ;;  %v42_v49 = vld [vmem:[%s2217_s0 + $0x78] sm:$0xff]  ;;  %v1228_v19 = vpack.c.bf16 %v470_v18, %v468_v17  ;;  %v57_v25 = vld [vmem:[%s2217_s0 + $0xf0] sm:$0xff]  ;;  %vm2118_vm1 = vmpackc.low %vm484_vm0, %vm484_vm0 }
  0x25   :  { %173 = vmatprep.mubr.f32.mxu0 %v1568_v3  ;;  %1207 = vmatprep.subr.bf16.mxu1 %v1206_v30  ;;  %v58_v26 = vld [vmem:[%s2217_s0 + $0xf8] sm:$0xff]  ;;  %v91_v30 = vld [vmem:[%s2219_s2] sm:$0x3] }
  0x28   :  { %174 = vmatmul.mubr.f32.gmra.mrb[2].mxu0 %v28_v63  ;;  %1209 = vmatpush1.bf16.msra.mxu1 %v1208_v36  ;;  %v463_v63 = vld [vmem:[%s2218_s3 + $0x138] sm:$0xff] }
  0x29   :  { %179 = vmatprep.mubr.f32.mxu0 %v1568_v3  ;;  %1211 = vmatprep.subr.bf16.mxu1 %v1210_v37  ;;  %v1218_v1 = vpack.c.bf16 %v463_v63, %v461_v62 }
  0x2c   :  { %180 = vmatmul.mubr.f32.gmra.mrb[4].mxu0 %v29_v7  ;;  %1213 = vmatpush1.bf16.msra.mxu1 %v1212_v41  ;;  %v467_v7 = vld [vmem:[%s2218_s3 + $0x158] sm:$0xff] }
  0x2d   :  { %185 = vmatprep.mubr.f32.mxu0 %v1568_v3  ;;  %1215 = vmatprep.subr.bf16.mxu1 %v1214_v58  ;;  %v1222_v9 = vpack.c.bf16 %v467_v7, %v465_v6 }
  0x30   :  { %186 = vmatmul.mubr.f32.gmra.mrb[6].mxu0 %v30_v14  ;;  %1217 = vmatpush1.bf16.msra.mxu1 %v1216_v61  ;;  %v471_v14 = vld [vmem:[%s2218_s3 + $0x178] sm:$0xff] }
  0x31   :  { %191 = vmatprep.mubr.f32.mxu0 %v1568_v3  ;;  %1219 = vmatprep.subr.bf16.mxu1 %v1218_v1  ;;  %v1226_v16 = vpack.c.bf16 %v471_v14, %v469_v13 }
  0x34   :  { %192 = vmatmul.mubr.f32.gmra.mrb[8].mxu0 %v31_v21  ;;  %1221 = vmatpush1.bf16.msra.mxu1 %v1220_v5  ;;  %v53_v21 = vld [vmem:[%s2217_s0 + $0xd0] sm:$0xff] }
  0x35   :  { %197 = vmatprep.mubr.f32.mxu0 %v1568_v3  ;;  %1223 = vmatprep.subr.bf16.mxu1 %v1222_v9 }
  0x38   :  { %198 = vmatmul.mubr.f32.gmra.mrb[10].mxu0 %v32_v28  ;;  %1225 = vmatpush1.bf16.msra.mxu1 %v1224_v12  ;;  %v1977_v28 = vshrl.u32 %v93_v27, 7 }
  0x39   :  { %203 = vmatprep.mubr.f32.mxu0 %v1568_v3  ;;  %1227 = vmatprep.subr.bf16.mxu1 %v1226_v16 }
  0x3a   :  { %v95_v29 = vsub.s32 0, %v1977_v28  ;;  %v99_v31 = vsub.s32 1, %v1977_v28 }
  0x3c   :  { %204 = vmatmul.mubr.f32.gmra.mrb[12].mxu0 %v33_v35  ;;  %1229 = vmatpush1.bf16.msra.mxu1 %v1228_v19  ;;  %v1986_v32 = vrot.slane %v91_v30, %v95_v29 }
  0x3d   :  { %209 = vmatprep.mubr.f32.mxu0 %v1568_v3 }
  0x40   :  { %210 = vmatmul.mubr.f32.gmra.mrb[14].mxu0 %v34_v40 }
  0x41   :  { %215 = vmatprep.mubr.f32.mxu0 %v1568_v3 }
  0x44   :  { %216 = vmatmul.mubr.f32.gmra.mrb[16].mxu0 %v35_v42 }
  0x45   :  { %221 = vmatprep.mubr.f32.mxu0 %v1568_v3 }
  0x48   :  { %222 = vmatmul.mubr.f32.gmra.mrb[18].mxu0 %v36_v43 }
  0x49   :  { %227 = vmatprep.mubr.f32.mxu0 %v1568_v3 }
  0x4c   :  { %228 = vmatmul.mubr.f32.gmra.mrb[20].mxu0 %v37_v44 }
  0x4d   :  { %233 = vmatprep.mubr.f32.mxu0 %v1568_v3 }
  0x50   :  { %234 = vmatmul.mubr.f32.gmra.mrb[22].mxu0 %v38_v45 }
  0x51   :  { %239 = vmatprep.mubr.f32.mxu0 %v1568_v3 }
  0x54   :  { %240 = vmatmul.mubr.f32.gmra.mrb[24].mxu0 %v39_v46 }
  0x55   :  { %245 = vmatprep.mubr.f32.mxu0 %v1568_v3 }
  0x58   :  { %246 = vmatmul.mubr.f32.gmra.mrb[26].mxu0 %v40_v47 }
  0x59   :  { %251 = vmatprep.mubr.f32.mxu0 %v1568_v3 }
  0x5c   :  { %252 = vmatmul.mubr.f32.gmra.mrb[28].mxu0 %v41_v48 }
  0x5d   :  { %257 = vmatprep.mubr.f32.mxu0 %v1568_v3 }
  0x60   :  { %258 = vmatmul.mubr.f32.gmra.mrb[30].mxu0 %v42_v49 }
  0x61   :  { %263 = vmatprep.mubr.f32.mxu0 %v1568_v3 }
  0x64   :  { %264 = vmatmul.mubr.f32.gmra.mrb[32].mxu0 %v43_v50 }
  0x65   :  { %269 = vmatprep.mubr.f32.mxu0 %v1568_v3 }
  0x68   :  { %270 = vmatmul.mubr.f32.gmra.mrb[34].mxu0 %v44_v51 }
  0x69   :  { %275 = vmatprep.mubr.f32.mxu0 %v1568_v3 }
  0x6c   :  { %276 = vmatmul.mubr.f32.gmra.mrb[36].mxu0 %v45_v52 }
  0x6d   :  { %281 = vmatprep.mubr.f32.mxu0 %v1568_v3 }
  0x70   :  { %282 = vmatmul.mubr.f32.gmra.mrb[38].mxu0 %v46_v53 }
  0x71   :  { %287 = vmatprep.mubr.f32.mxu0 %v1568_v3 }
  0x74   :  { %288 = vmatmul.mubr.f32.gmra.mrb[40].mxu0 %v47_v54 }
  0x75   :  { %293 = vmatprep.mubr.f32.mxu0 %v1568_v3 }
  0x78   :  { %294 = vmatmul.mubr.f32.gmra.mrb[42].mxu0 %v48_v57 }
  0x79   :  { %299 = vmatprep.mubr.f32.mxu0 %v1568_v3 }
  0x7c   :  { %300 = vmatmul.mubr.f32.gmra.mrb[44].mxu0 %v49_v0 }
  0x7d   :  { %305 = vmatprep.mubr.f32.mxu0 %v1568_v3 }
  0x80   :  { %306 = vmatmul.mubr.f32.gmra.mrb[46].mxu0 %v50_v8 }
  0x81   :  { %311 = vmatprep.mubr.f32.mxu0 %v1568_v3 }
  0x84   :  { %312 = vmatmul.mubr.f32.gmra.mrb[48].mxu0 %v51_v15 }
  0x85   :  { %317 = vmatprep.mubr.f32.mxu0 %v1568_v3 }
  0x88   :  { %318 = vmatmul.mubr.f32.gmra.mrb[50].mxu0 %v52_v20 }
  0x89   :  { %323 = vmatprep.mubr.f32.mxu0 %v1568_v3 }
  0x8c   :  { %324 = vmatmul.mubr.f32.gmra.mrb[52].mxu0 %v53_v21 }
  0x8d   :  { %329 = vmatprep.mubr.f32.mxu0 %v1568_v3 }
  0x90   :  { %330 = vmatmul.mubr.f32.gmra.mrb[54].mxu0 %v54_v22 }
  0x91   :  { %335 = vmatprep.mubr.f32.mxu0 %v1568_v3 }
  0x94   :  { %336 = vmatmul.mubr.f32.gmra.mrb[56].mxu0 %v55_v23 }
  0x95   :  { %341 = vmatprep.mubr.f32.mxu0 %v1568_v3 }
  0x98   :  { %342 = vmatmul.mubr.f32.gmra.mrb[58].mxu0 %v56_v24 }
  0x99   :  { %347 = vmatprep.mubr.f32.mxu0 %v1568_v3 }
  0x9c   :  { %348 = vmatmul.mubr.f32.gmra.mrb[60].mxu0 %v57_v25 }
  0x9d   :  { %353 = vmatprep.mubr.f32.mxu0 %v1568_v3  ;;  %v1990_v3 = vrot.slane %v91_v30, %v99_v31 }
  0xa0   :  { %354 = vmatmul.mubr.f32.gmra.mrb[62].mxu0 %v58_v26 }
  0xf7   :  { %v169_v33 = vpop.f32.mrb[0].mxu0 }
  0xf8   :  { %v170_v34 = vadd.f32 %v169_v33, %v1986_v32  ;;  %v171_v35 = vpop.f32.mrb[1].mxu0 }
  0xf9   :  { %v172_v36 = vadd.f32 %v171_v35, %v1990_v3 }
  0xfb   :  { %1312 = vtanh.f32 %v172_v36  ;;  %v175_v37 = vpop.f32.mrb[2].mxu0 }
  0xfc   :  { %1314 = vtanh.f32 %v170_v34  ;;  %v176_v38 = vadd.f32 %v175_v37, %v1986_v32  ;;  %v177_v39 = vpop.f32.mrb[3].mxu0 }
  0xfd   :  { %v178_v40 = vadd.f32 %v177_v39, %v1990_v3 }
  0xff   :  { %1316 = vtanh.f32 %v178_v40  ;;  %v181_v41 = vpop.f32.mrb[4].mxu0 }
 0x100   :  { %1318 = vtanh.f32 %v176_v38  ;;  %v182_v42 = vadd.f32 %v181_v41, %v1986_v32  ;;  %v183_v43 = vpop.f32.mrb[5].mxu0 }
 0x101   :  { %v184_v44 = vadd.f32 %v183_v43, %v1990_v3 }
 0x103   :  { %1320 = vtanh.f32 %v184_v44  ;;  %v187_v45 = vpop.f32.mrb[6].mxu0 }
 0x104   :  { %1322 = vtanh.f32 %v182_v42  ;;  %v188_v46 = vadd.f32 %v187_v45, %v1986_v32  ;;  %v189_v47 = vpop.f32.mrb[7].mxu0 }
 0x105   :  { %v1313_v48 = vpop.eup %1312  ;;  %v190_v49 = vadd.f32 %v189_v47, %v1990_v3 }
 0x106   :  { %v1315_v50 = vpop.eup %1314  ;;  %1085 = vmatprep.mubr.msk.f32.mxu1 %vm484_vm0, %v1313_v48 }
 0x107   :  { %1324 = vtanh.f32 %v190_v49  ;;  %v193_v51 = vpop.f32.mrb[8].mxu0  ;;  %646 = vmatmul.mubr.f32.vlgmr.msra.gmra.mrb[0].mxu1 %v1315_v50 }
 0x108   :  { %1326 = vtanh.f32 %v188_v46  ;;  %v194_v52 = vadd.f32 %v193_v51, %v1986_v32  ;;  %v195_v53 = vpop.f32.mrb[9].mxu0 }
 0x109   :  { %v1317_v54 = vpop.eup %1316  ;;  %v196_v55 = vadd.f32 %v195_v53, %v1990_v3 }
 0x10a   :  { %v1319_v56 = vpop.eup %1318  ;;  %1086 = vmatprep.mubr.msk.f32.mxu1 %vm484_vm0, %v1317_v54 }
 0x10b   :  { %1328 = vtanh.f32 %v196_v55  ;;  %v199_v57 = vpop.f32.mrb[10].mxu0  ;;  %652 = vmatmul.mubr.f32.gmra.mrb[2].mxu1 %v1319_v56 }
 0x10c   :  { %1330 = vtanh.f32 %v194_v52  ;;  %v200_v58 = vadd.f32 %v199_v57, %v1986_v32  ;;  %v201_v59 = vpop.f32.mrb[11].mxu0 }
 0x10d   :  { %v1321_v60 = vpop.eup %1320  ;;  %v202_v61 = vadd.f32 %v201_v59, %v1990_v3 }
 0x10e   :  { %v1323_v62 = vpop.eup %1322  ;;  %1087 = vmatprep.mubr.msk.f32.mxu1 %vm484_vm0, %v1321_v60 }
 0x10f   :  { %1332 = vtanh.f32 %v202_v61  ;;  %v205_v63 = vpop.f32.mrb[12].mxu0  ;;  %658 = vmatmul.mubr.f32.gmra.mrb[4].mxu1 %v1323_v62 }
 0x110   :  { %1334 = vtanh.f32 %v200_v58  ;;  %v206_v0 = vadd.f32 %v205_v63, %v1986_v32  ;;  %v207_v1 = vpop.f32.mrb[13].mxu0 }
 0x111   :  { %v1325_v2 = vpop.eup %1324  ;;  %v208_v4 = vadd.f32 %v207_v1, %v1990_v3 }
 0x112   :  { %v1327_v5 = vpop.eup %1326  ;;  %1088 = vmatprep.mubr.msk.f32.mxu1 %vm484_vm0, %v1325_v2 }
 0x113   :  { %1336 = vtanh.f32 %v208_v4  ;;  %v211_v6 = vpop.f32.mrb[14].mxu0  ;;  %664 = vmatmul.mubr.f32.gmra.mrb[6].mxu1 %v1327_v5 }
 0x114   :  { %1338 = vtanh.f32 %v206_v0  ;;  %v212_v7 = vadd.f32 %v211_v6, %v1986_v32  ;;  %v213_v8 = vpop.f32.mrb[15].mxu0 }
 0x115   :  { %v1329_v9 = vpop.eup %1328  ;;  %v214_v10 = vadd.f32 %v213_v8, %v1990_v3 }
 0x116   :  { %v1331_v11 = vpop.eup %1330  ;;  %1089 = vmatprep.mubr.msk.f32.mxu1 %vm484_vm0, %v1329_v9 }
 0x117   :  { %1340 = vtanh.f32 %v214_v10  ;;  %v217_v12 = vpop.f32.mrb[16].mxu0  ;;  %670 = vmatmul.mubr.f32.gmra.mrb[8].mxu1 %v1331_v11 }
 0x118   :  { %1342 = vtanh.f32 %v212_v7  ;;  %v218_v13 = vadd.f32 %v217_v12, %v1986_v32  ;;  %v219_v14 = vpop.f32.mrb[17].mxu0 }
 0x119   :  { %v1333_v15 = vpop.eup %1332  ;;  %v220_v16 = vadd.f32 %v219_v14, %v1990_v3 }
 0x11a   :  { %v1335_v17 = vpop.eup %1334  ;;  %1090 = vmatprep.mubr.msk.f32.mxu1 %vm484_vm0, %v1333_v15 }
 0x11b   :  { %1344 = vtanh.f32 %v220_v16  ;;  %v223_v18 = vpop.f32.mrb[18].mxu0  ;;  %676 = vmatmul.mubr.f32.gmra.mrb[10].mxu1 %v1335_v17 }
 0x11c   :  { %1346 = vtanh.f32 %v218_v13  ;;  %v224_v19 = vadd.f32 %v223_v18, %v1986_v32  ;;  %v225_v20 = vpop.f32.mrb[19].mxu0 }
 0x11d   :  { %v1337_v21 = vpop.eup %1336  ;;  %v226_v22 = vadd.f32 %v225_v20, %v1990_v3 }
 0x11e   :  { %v1339_v23 = vpop.eup %1338  ;;  %1091 = vmatprep.mubr.msk.f32.mxu1 %vm484_vm0, %v1337_v21 }
 0x11f   :  { %1348 = vtanh.f32 %v226_v22  ;;  %v229_v24 = vpop.f32.mrb[20].mxu0  ;;  %682 = vmatmul.mubr.f32.gmra.mrb[12].mxu1 %v1339_v23 }
 0x120   :  { %1350 = vtanh.f32 %v224_v19  ;;  %v230_v25 = vadd.f32 %v229_v24, %v1986_v32  ;;  %v231_v26 = vpop.f32.mrb[21].mxu0 }
 0x121   :  { %v1341_v27 = vpop.eup %1340  ;;  %v232_v30 = vadd.f32 %v231_v26, %v1990_v3 }
 0x122   :  { %v1343_v33 = vpop.eup %1342  ;;  %1092 = vmatprep.mubr.msk.f32.mxu1 %vm484_vm0, %v1341_v27 }
 0x123   :  { %1352 = vtanh.f32 %v232_v30  ;;  %v235_v34 = vpop.f32.mrb[22].mxu0  ;;  %688 = vmatmul.mubr.f32.gmra.mrb[14].mxu1 %v1343_v33 }
 0x124   :  { %1354 = vtanh.f32 %v230_v25  ;;  %v236_v35 = vadd.f32 %v235_v34, %v1986_v32  ;;  %v237_v36 = vpop.f32.mrb[23].mxu0 }
 0x125   :  { %v1345_v37 = vpop.eup %1344  ;;  %v238_v38 = vadd.f32 %v237_v36, %v1990_v3 }
 0x126   :  { %v1347_v39 = vpop.eup %1346  ;;  %1093 = vmatprep.mubr.msk.f32.mxu1 %vm484_vm0, %v1345_v37 }
 0x127   :  { %1356 = vtanh.f32 %v238_v38  ;;  %v241_v40 = vpop.f32.mrb[24].mxu0  ;;  %694 = vmatmul.mubr.f32.gmra.mrb[16].mxu1 %v1347_v39 }
 0x128   :  { %1358 = vtanh.f32 %v236_v35  ;;  %v242_v41 = vadd.f32 %v241_v40, %v1986_v32  ;;  %v243_v42 = vpop.f32.mrb[25].mxu0 }
 0x129   :  { %v1349_v43 = vpop.eup %1348  ;;  %v244_v44 = vadd.f32 %v243_v42, %v1990_v3 }
 0x12a   :  { %v1351_v45 = vpop.eup %1350  ;;  %1094 = vmatprep.mubr.msk.f32.mxu1 %vm484_vm0, %v1349_v43 }
 0x12b   :  { %1360 = vtanh.f32 %v244_v44  ;;  %v247_v46 = vpop.f32.mrb[26].mxu0  ;;  %700 = vmatmul.mubr.f32.gmra.mrb[18].mxu1 %v1351_v45 }
 0x12c   :  { %1362 = vtanh.f32 %v242_v41  ;;  %v248_v47 = vadd.f32 %v247_v46, %v1986_v32  ;;  %v249_v48 = vpop.f32.mrb[27].mxu0 }
 0x12d   :  { %v1353_v49 = vpop.eup %1352  ;;  %v250_v50 = vadd.f32 %v249_v48, %v1990_v3 }
 0x12e   :  { %v1355_v51 = vpop.eup %1354  ;;  %1095 = vmatprep.mubr.msk.f32.mxu1 %vm484_vm0, %v1353_v49 }
 0x12f   :  { %1364 = vtanh.f32 %v250_v50  ;;  %v253_v52 = vpop.f32.mrb[28].mxu0  ;;  %706 = vmatmul.mubr.f32.gmra.mrb[20].mxu1 %v1355_v51 }
 0x130   :  { %1366 = vtanh.f32 %v248_v47  ;;  %v254_v53 = vadd.f32 %v253_v52, %v1986_v32  ;;  %v255_v54 = vpop.f32.mrb[29].mxu0 }
 0x131   :  { %v1357_v55 = vpop.eup %1356  ;;  %v256_v56 = vadd.f32 %v255_v54, %v1990_v3 }
 0x132   :  { %v1359_v57 = vpop.eup %1358  ;;  %1096 = vmatprep.mubr.msk.f32.mxu1 %vm484_vm0, %v1357_v55 }
 0x133   :  { %1368 = vtanh.f32 %v256_v56  ;;  %v259_v58 = vpop.f32.mrb[30].mxu0  ;;  %712 = vmatmul.mubr.f32.gmra.mrb[22].mxu1 %v1359_v57 }
 0x134   :  { %1370 = vtanh.f32 %v254_v53  ;;  %v260_v59 = vadd.f32 %v259_v58, %v1986_v32  ;;  %v261_v60 = vpop.f32.mrb[31].mxu0 }
 0x135   :  { %v1361_v61 = vpop.eup %1360  ;;  %v262_v62 = vadd.f32 %v261_v60, %v1990_v3 }
 0x136   :  { %v1363_v63 = vpop.eup %1362  ;;  %1097 = vmatprep.mubr.msk.f32.mxu1 %vm484_vm0, %v1361_v61 }
 0x137   :  { %1372 = vtanh.f32 %v262_v62  ;;  %v265_v0 = vpop.f32.mrb[32].mxu0  ;;  %718 = vmatmul.mubr.f32.gmra.mrb[24].mxu1 %v1363_v63 }
 0x138   :  { %1374 = vtanh.f32 %v260_v59  ;;  %v266_v1 = vadd.f32 %v265_v0, %v1986_v32  ;;  %v267_v2 = vpop.f32.mrb[33].mxu0 }
 0x139   :  { %v1365_v4 = vpop.eup %1364  ;;  %v268_v5 = vadd.f32 %v267_v2, %v1990_v3 }
 0x13a   :  { %v1367_v6 = vpop.eup %1366  ;;  %1098 = vmatprep.mubr.msk.f32.mxu1 %vm484_vm0, %v1365_v4 }
 0x13b   :  { %1376 = vtanh.f32 %v268_v5  ;;  %v271_v7 = vpop.f32.mrb[34].mxu0  ;;  %724 = vmatmul.mubr.f32.gmra.mrb[26].mxu1 %v1367_v6 }
 0x13c   :  { %1378 = vtanh.f32 %v266_v1  ;;  %v272_v8 = vadd.f32 %v271_v7, %v1986_v32  ;;  %v273_v9 = vpop.f32.mrb[35].mxu0 }
 0x13d   :  { %v1369_v10 = vpop.eup %1368  ;;  %v274_v11 = vadd.f32 %v273_v9, %v1990_v3 }
 0x13e   :  { %v1371_v12 = vpop.eup %1370  ;;  %1099 = vmatprep.mubr.msk.f32.mxu1 %vm484_vm0, %v1369_v10 }
 0x13f   :  { %1380 = vtanh.f32 %v274_v11  ;;  %v277_v13 = vpop.f32.mrb[36].mxu0  ;;  %730 = vmatmul.mubr.f32.gmra.mrb[28].mxu1 %v1371_v12 }
 0x140   :  { %1382 = vtanh.f32 %v272_v8  ;;  %v278_v14 = vadd.f32 %v277_v13, %v1986_v32  ;;  %v279_v15 = vpop.f32.mrb[37].mxu0 }
 0x141   :  { %v1373_v16 = vpop.eup %1372  ;;  %v280_v17 = vadd.f32 %v279_v15, %v1990_v3 }
 0x142   :  { %v1375_v18 = vpop.eup %1374  ;;  %1100 = vmatprep.mubr.msk.f32.mxu1 %vm484_vm0, %v1373_v16 }
 0x143   :  { %1384 = vtanh.f32 %v280_v17  ;;  %v283_v19 = vpop.f32.mrb[38].mxu0  ;;  %736 = vmatmul.mubr.f32.gmra.mrb[30].mxu1 %v1375_v18 }
 0x144   :  { %1386 = vtanh.f32 %v278_v14  ;;  %v284_v20 = vadd.f32 %v283_v19, %v1986_v32  ;;  %v285_v21 = vpop.f32.mrb[39].mxu0 }
 0x145   :  { %v1377_v22 = vpop.eup %1376  ;;  %v286_v23 = vadd.f32 %v285_v21, %v1990_v3 }
 0x146   :  { %v1379_v24 = vpop.eup %1378  ;;  %1101 = vmatprep.mubr.msk.f32.mxu1 %vm484_vm0, %v1377_v22 }
 0x147   :  { %1388 = vtanh.f32 %v286_v23  ;;  %v289_v25 = vpop.f32.mrb[40].mxu0  ;;  %742 = vmatmul.mubr.f32.gmra.mrb[32].mxu1 %v1379_v24 }
 0x148   :  { %1390 = vtanh.f32 %v284_v20  ;;  %v290_v26 = vadd.f32 %v289_v25, %v1986_v32  ;;  %v291_v27 = vpop.f32.mrb[41].mxu0 }
 0x149   :  { %v1381_v30 = vpop.eup %1380  ;;  %v292_v33 = vadd.f32 %v291_v27, %v1990_v3 }
 0x14a   :  { %v1383_v34 = vpop.eup %1382  ;;  %1102 = vmatprep.mubr.msk.f32.mxu1 %vm484_vm0, %v1381_v30 }
 0x14b   :  { %1392 = vtanh.f32 %v292_v33  ;;  %v295_v35 = vpop.f32.mrb[42].mxu0  ;;  %748 = vmatmul.mubr.f32.gmra.mrb[34].mxu1 %v1383_v34 }
 0x14c   :  { %1394 = vtanh.f32 %v290_v26  ;;  %v296_v36 = vadd.f32 %v295_v35, %v1986_v32  ;;  %v297_v37 = vpop.f32.mrb[43].mxu0 }
 0x14d   :  { %v1385_v38 = vpop.eup %1384  ;;  %v298_v39 = vadd.f32 %v297_v37, %v1990_v3 }
 0x14e   :  { %v1387_v40 = vpop.eup %1386  ;;  %1103 = vmatprep.mubr.msk.f32.mxu1 %vm484_vm0, %v1385_v38 }
 0x14f   :  { %1396 = vtanh.f32 %v298_v39  ;;  %v301_v41 = vpop.f32.mrb[44].mxu0  ;;  %754 = vmatmul.mubr.f32.gmra.mrb[36].mxu1 %v1387_v40 }
 0x150   :  { %1398 = vtanh.f32 %v296_v36  ;;  %v302_v42 = vadd.f32 %v301_v41, %v1986_v32  ;;  %v303_v43 = vpop.f32.mrb[45].mxu0 }
 0x151   :  { %v1389_v44 = vpop.eup %1388  ;;  %v304_v45 = vadd.f32 %v303_v43, %v1990_v3 }
 0x152   :  { %v1391_v46 = vpop.eup %1390  ;;  %1104 = vmatprep.mubr.msk.f32.mxu1 %vm484_vm0, %v1389_v44 }
 0x153   :  { %1400 = vtanh.f32 %v304_v45  ;;  %v307_v47 = vpop.f32.mrb[46].mxu0  ;;  %760 = vmatmul.mubr.f32.gmra.mrb[38].mxu1 %v1391_v46 }
 0x154   :  { %1402 = vtanh.f32 %v302_v42  ;;  %v308_v48 = vadd.f32 %v307_v47, %v1986_v32  ;;  %v309_v49 = vpop.f32.mrb[47].mxu0 }
 0x155   :  { %v1393_v50 = vpop.eup %1392  ;;  %v310_v51 = vadd.f32 %v309_v49, %v1990_v3 }
 0x156   :  { %v1395_v52 = vpop.eup %1394  ;;  %1105 = vmatprep.mubr.msk.f32.mxu1 %vm484_vm0, %v1393_v50 }
 0x157   :  { %1404 = vtanh.f32 %v310_v51  ;;  %v313_v53 = vpop.f32.mrb[48].mxu0  ;;  %766 = vmatmul.mubr.f32.gmra.mrb[40].mxu1 %v1395_v52 }
 0x158   :  { %1406 = vtanh.f32 %v308_v48  ;;  %v314_v54 = vadd.f32 %v313_v53, %v1986_v32  ;;  %v315_v55 = vpop.f32.mrb[49].mxu0 }
 0x159   :  { %v1397_v56 = vpop.eup %1396  ;;  %v316_v57 = vadd.f32 %v315_v55, %v1990_v3 }
 0x15a   :  { %v1399_v58 = vpop.eup %1398  ;;  %1106 = vmatprep.mubr.msk.f32.mxu1 %vm484_vm0, %v1397_v56 }
 0x15b   :  { %1408 = vtanh.f32 %v316_v57  ;;  %v319_v59 = vpop.f32.mrb[50].mxu0  ;;  %772 = vmatmul.mubr.f32.gmra.mrb[42].mxu1 %v1399_v58 }
 0x15c   :  { %1410 = vtanh.f32 %v314_v54  ;;  %v320_v60 = vadd.f32 %v319_v59, %v1986_v32  ;;  %v321_v61 = vpop.f32.mrb[51].mxu0 }
 0x15d   :  { %v1401_v62 = vpop.eup %1400  ;;  %v322_v63 = vadd.f32 %v321_v61, %v1990_v3 }
 0x15e   :  { %v1403_v0 = vpop.eup %1402  ;;  %1107 = vmatprep.mubr.msk.f32.mxu1 %vm484_vm0, %v1401_v62 }
 0x15f   :  { %1412 = vtanh.f32 %v322_v63  ;;  %v325_v1 = vpop.f32.mrb[52].mxu0  ;;  %778 = vmatmul.mubr.f32.gmra.mrb[44].mxu1 %v1403_v0  ;;  %v2110_v63 = vld [vmem:[%s2221_s5] sm:$0xff] }
 0x160   :  { %1414 = vtanh.f32 %v320_v60  ;;  %v326_v2 = vadd.f32 %v325_v1, %v1986_v32  ;;  %v327_v4 = vpop.f32.mrb[53].mxu0 }
 0x161   :  { %v1405_v5 = vpop.eup %1404  ;;  %v328_v6 = vadd.f32 %v327_v4, %v1990_v3 }
 0x162   :  { %v1407_v7 = vpop.eup %1406  ;;  %1108 = vmatprep.mubr.msk.f32.mxu1 %vm484_vm0, %v1405_v5 }
 0x163   :  { %1416 = vtanh.f32 %v328_v6  ;;  %v331_v8 = vpop.f32.mrb[54].mxu0  ;;  %784 = vmatmul.mubr.f32.gmra.mrb[46].mxu1 %v1407_v7 }
 0x164   :  { %1418 = vtanh.f32 %v326_v2  ;;  %v332_v9 = vadd.f32 %v331_v8, %v1986_v32  ;;  %v333_v10 = vpop.f32.mrb[55].mxu0  ;;  %v906_v2 = vcombine.high %v2110_v63, %v2110_v63 }
 0x165   :  { %v1409_v11 = vpop.eup %1408  ;;  %v334_v12 = vadd.f32 %v333_v10, %v1990_v3 }
 0x166   :  { %v1411_v13 = vpop.eup %1410  ;;  %1109 = vmatprep.mubr.msk.f32.mxu1 %vm484_vm0, %v1409_v11  ;;  %1149 = vmatprep.mubr.msk.f32.mxu0 %vm484_vm0, %v906_v2 }
 0x167   :  { %1420 = vtanh.f32 %v334_v12  ;;  %v337_v14 = vpop.f32.mrb[56].mxu0  ;;  %790 = vmatmul.mubr.f32.gmra.mrb[48].mxu1 %v1411_v13 }
 0x168   :  { %1422 = vtanh.f32 %v332_v9  ;;  %v338_v15 = vadd.f32 %v337_v14, %v1986_v32  ;;  %v339_v16 = vpop.f32.mrb[57].mxu0 }
 0x169   :  { %v1413_v17 = vpop.eup %1412  ;;  %v340_v18 = vadd.f32 %v339_v16, %v1990_v3 }
 0x16a   :  { %v1415_v19 = vpop.eup %1414  ;;  %1110 = vmatprep.mubr.msk.f32.mxu1 %vm484_vm0, %v1413_v17 }
 0x16b   :  { %1424 = vtanh.f32 %v340_v18  ;;  %v343_v20 = vpop.f32.mrb[58].mxu0  ;;  %796 = vmatmul.mubr.f32.gmra.mrb[50].mxu1 %v1415_v19 }
 0x16c   :  { %1426 = vtanh.f32 %v338_v15  ;;  %v344_v21 = vadd.f32 %v343_v20, %v1986_v32  ;;  %v345_v22 = vpop.f32.mrb[59].mxu0 }
 0x16d   :  { %v1417_v23 = vpop.eup %1416  ;;  %v346_v24 = vadd.f32 %v345_v22, %v1990_v3 }
 0x16e   :  { %v1419_v25 = vpop.eup %1418  ;;  %1111 = vmatprep.mubr.msk.f32.mxu1 %vm484_vm0, %v1417_v23 }
 0x16f   :  { %1428 = vtanh.f32 %v346_v24  ;;  %v349_v26 = vpop.f32.mrb[60].mxu0  ;;  %802 = vmatmul.mubr.f32.gmra.mrb[52].mxu1 %v1419_v25 }
 0x170   :  { %1430 = vtanh.f32 %v344_v21  ;;  %v350_v27 = vadd.f32 %v349_v26, %v1986_v32  ;;  %v351_v30 = vpop.f32.mrb[61].mxu0 }
 0x171   :  { %v1421_v33 = vpop.eup %1420  ;;  %v352_v34 = vadd.f32 %v351_v30, %v1990_v3 }
 0x172   :  { %v1423_v35 = vpop.eup %1422  ;;  %1112 = vmatprep.mubr.msk.f32.mxu1 %vm484_vm0, %v1421_v33 }
 0x173   :  { %1432 = vtanh.f32 %v352_v34  ;;  %v355_v36 = vpop.f32.mrb[62].mxu0  ;;  %808 = vmatmul.mubr.f32.gmra.mrb[54].mxu1 %v1423_v35 }
 0x174   :  { %1434 = vtanh.f32 %v350_v27  ;;  %v356_v37 = vadd.f32 %v355_v36, %v1986_v32  ;;  %v357_v38 = vpop.f32.mrb[63].mxu0 }
 0x175   :  { %v1425_v39 = vpop.eup %1424  ;;  %v358_v40 = vadd.f32 %v357_v38, %v1990_v3  ;;  %v472_v3 = vld [vmem:[%s2220_s4] sm:$0x3] }
 0x176   :  { %v1427_v41 = vpop.eup %1426  ;;  %1113 = vmatprep.mubr.msk.f32.mxu1 %vm484_vm0, %v1425_v39  ;;  %v2093_v47 = vrot.slane %v472_v3, %v95_v29  ;;  %v2097_v48 = vrot.slane %v472_v3, %v99_v31 }
 0x177   :  { %1436 = vtanh.f32 %v358_v40  ;;  %814 = vmatmul.mubr.f32.gmra.mrb[56].mxu1 %v1427_v41 }
 0x178   :  { %1438 = vtanh.f32 %v356_v37 }
 0x179   :  { %v1429_v42 = vpop.eup %1428 }
 0x17a   :  { %v1431_v43 = vpop.eup %1430  ;;  %1114 = vmatprep.mubr.msk.f32.mxu1 %vm484_vm0, %v1429_v42 }
 0x17b   :  { %820 = vmatmul.mubr.f32.gmra.mrb[58].mxu1 %v1431_v43 }
 0x17d   :  { %v1433_v44 = vpop.eup %1432 }
 0x17e   :  { %v1435_v45 = vpop.eup %1434  ;;  %1115 = vmatprep.mubr.msk.f32.mxu1 %vm484_vm0, %v1433_v44 }
 0x17f   :  { %826 = vmatmul.mubr.f32.gmra.mrb[60].mxu1 %v1435_v45 }
 0x181   :  { %v1437_v32 = vpop.eup %1436 }
 0x182   :  { %v1439_v46 = vpop.eup %1438  ;;  %1116 = vmatprep.mubr.msk.f32.mxu1 %vm484_vm0, %v1437_v32 }
 0x183   :  { %832 = vmatmul.mubr.f32.gmra.mrb[62].mxu1 %v1439_v46 }
 0x1da   :  { %v647_v49 = vpop.f32.mrb[0].mxu1 }
 0x1db   :  { %v648_v50 = vadd.f32 %v647_v49, %v2093_v47  ;;  %v649_v51 = vpop.f32.mrb[1].mxu1 }
 0x1dc   :  { %v650_v52 = vadd.f32 %v649_v51, %v2097_v48 }
 0x1dd   :  { %1440 = vtanh.f32 %v648_v50 }
 0x1de   :  { %v653_v53 = vpop.f32.mrb[2].mxu1  ;;  %1442 = vtanh.f32 %v650_v52 }
 0x1df   :  { %v654_v54 = vadd.f32 %v653_v53, %v2093_v47  ;;  %v655_v55 = vpop.f32.mrb[3].mxu1 }
 0x1e0   :  { %v656_v56 = vadd.f32 %v655_v55, %v2097_v48 }
 0x1e1   :  { %1444 = vtanh.f32 %v654_v54 }
 0x1e2   :  { %1446 = vtanh.f32 %v656_v56  ;;  %v659_v29 = vpop.f32.mrb[4].mxu1 }
 0x1e3   :  { %v660_v28 = vadd.f32 %v659_v29, %v2093_v47  ;;  %v661_v31 = vpop.f32.mrb[5].mxu1 }
 0x1e4   :  { %v662_v57 = vadd.f32 %v661_v31, %v2097_v48 }
 0x1e5   :  { %1448 = vtanh.f32 %v660_v28 }
 0x1e6   :  { %v665_v58 = vpop.f32.mrb[6].mxu1  ;;  %1450 = vtanh.f32 %v662_v57 }
 0x1e7   :  { %v666_v59 = vadd.f32 %v665_v58, %v2093_v47  ;;  %v667_v60 = vpop.f32.mrb[7].mxu1  ;;  %v1441_v62 = vpop.eup %1440 }
 0x1e8   :  { %v668_v61 = vadd.f32 %v667_v60, %v2097_v48  ;;  %v1443_v0 = vpop.eup %1442 }
 0x1e9   :  { %1452 = vtanh.f32 %v666_v59 }
 0x1ea   :  { %1454 = vtanh.f32 %v668_v61  ;;  %v671_v1 = vpop.f32.mrb[8].mxu1 }
 0x1eb   :  { %v1445_v4 = vpop.eup %1444  ;;  %v672_v5 = vadd.f32 %v671_v1, %v2093_v47  ;;  %v673_v6 = vpop.f32.mrb[9].mxu1 }
 0x1ec   :  { %v1447_v7 = vpop.eup %1446  ;;  %v674_v8 = vadd.f32 %v673_v6, %v2097_v48  ;;  %v1233_v10 = vpack.c.bf16 %v1445_v4, %v1441_v62 }
 0x1ed   :  { %v1230_v11 = vpack.c.bf16 %v1447_v7, %v1443_v0  ;;  %1456 = vtanh.f32 %v672_v5 }
 0x1ee   :  { %v677_v12 = vpop.f32.mrb[10].mxu1  ;;  %1458 = vtanh.f32 %v674_v8 }
 0x1ef   :  { %v678_v13 = vadd.f32 %v677_v12, %v2093_v47  ;;  %v679_v14 = vpop.f32.mrb[11].mxu1  ;;  %1232 = vmatprep.subr.msk.bf16.mxu0 %vm2118_vm1, %v1230_v11  ;;  %v1449_v16 = vpop.eup %1448 }
 0x1f0   :  { %v680_v15 = vadd.f32 %v679_v14, %v2097_v48  ;;  %1234 = vmatpush1.bf16.xpose.msra.mxu0 %v1233_v10  ;;  %v1451_v17 = vpop.eup %1450 }
 0x1f1   :  { %1460 = vtanh.f32 %v678_v13 }
 0x1f2   :  { %1462 = vtanh.f32 %v680_v15  ;;  %v683_v18 = vpop.f32.mrb[12].mxu1 }
 0x1f3   :  { %v1453_v19 = vpop.eup %1452  ;;  %v684_v20 = vadd.f32 %v683_v18, %v2093_v47  ;;  %v685_v21 = vpop.f32.mrb[13].mxu1 }
 0x1f4   :  { %v1455_v22 = vpop.eup %1454  ;;  %v686_v23 = vadd.f32 %v685_v21, %v2097_v48  ;;  %v1238_v24 = vpack.c.bf16 %v1453_v19, %v1449_v16 }
 0x1f5   :  { %v1235_v25 = vpack.c.bf16 %v1455_v22, %v1451_v17  ;;  %1464 = vtanh.f32 %v684_v20 }
 0x1f6   :  { %v689_v26 = vpop.f32.mrb[14].mxu1  ;;  %1466 = vtanh.f32 %v686_v23 }
 0x1f7   :  { %v690_v27 = vadd.f32 %v689_v26, %v2093_v47  ;;  %v691_v30 = vpop.f32.mrb[15].mxu1  ;;  %1237 = vmatprep.subr.msk.bf16.mxu0 %vm2118_vm1, %v1235_v25  ;;  %v1457_v34 = vpop.eup %1456 }
 0x1f8   :  { %v692_v33 = vadd.f32 %v691_v30, %v2097_v48  ;;  %1239 = vmatpush1.bf16.xpose.msra.mxu0 %v1238_v24  ;;  %v1459_v35 = vpop.eup %1458 }
 0x1f9   :  { %1468 = vtanh.f32 %v690_v27 }
 0x1fa   :  { %1470 = vtanh.f32 %v692_v33  ;;  %v695_v36 = vpop.f32.mrb[16].mxu1 }
 0x1fb   :  { %v1461_v37 = vpop.eup %1460  ;;  %v696_v38 = vadd.f32 %v695_v36, %v2093_v47  ;;  %v697_v39 = vpop.f32.mrb[17].mxu1 }
 0x1fc   :  { %v1463_v40 = vpop.eup %1462  ;;  %v698_v41 = vadd.f32 %v697_v39, %v2097_v48  ;;  %v1243_v42 = vpack.c.bf16 %v1461_v37, %v1457_v34 }
 0x1fd   :  { %v1240_v43 = vpack.c.bf16 %v1463_v40, %v1459_v35  ;;  %1472 = vtanh.f32 %v696_v38 }
 0x1fe   :  { %v701_v44 = vpop.f32.mrb[18].mxu1  ;;  %1474 = vtanh.f32 %v698_v41 }
 0x1ff   :  { %v702_v45 = vadd.f32 %v701_v44, %v2093_v47  ;;  %v703_v32 = vpop.f32.mrb[19].mxu1  ;;  %1242 = vmatprep.subr.msk.bf16.mxu0 %vm2118_vm1, %v1240_v43  ;;  %v1465_v3 = vpop.eup %1464 }
 0x200   :  { %v704_v46 = vadd.f32 %v703_v32, %v2097_v48  ;;  %1244 = vmatpush1.bf16.xpose.msra.mxu0 %v1243_v42  ;;  %v1467_v49 = vpop.eup %1466 }
 0x201   :  { %1476 = vtanh.f32 %v702_v45 }
 0x202   :  { %1478 = vtanh.f32 %v704_v46  ;;  %v707_v50 = vpop.f32.mrb[20].mxu1 }
 0x203   :  { %v1469_v51 = vpop.eup %1468  ;;  %v708_v52 = vadd.f32 %v707_v50, %v2093_v47  ;;  %v709_v53 = vpop.f32.mrb[21].mxu1 }
 0x204   :  { %v1471_v54 = vpop.eup %1470  ;;  %v710_v55 = vadd.f32 %v709_v53, %v2097_v48  ;;  %v1248_v56 = vpack.c.bf16 %v1469_v51, %v1465_v3 }
 0x205   :  { %v1245_v29 = vpack.c.bf16 %v1471_v54, %v1467_v49  ;;  %1480 = vtanh.f32 %v708_v52 }
 0x206   :  { %v713_v28 = vpop.f32.mrb[22].mxu1  ;;  %1482 = vtanh.f32 %v710_v55 }
 0x207   :  { %v714_v31 = vadd.f32 %v713_v28, %v2093_v47  ;;  %v715_v57 = vpop.f32.mrb[23].mxu1  ;;  %1247 = vmatprep.subr.msk.bf16.mxu0 %vm2118_vm1, %v1245_v29  ;;  %v1473_v59 = vpop.eup %1472 }
 0x208   :  { %v716_v58 = vadd.f32 %v715_v57, %v2097_v48  ;;  %1249 = vmatpush1.bf16.xpose.msra.mxu0 %v1248_v56  ;;  %v1475_v60 = vpop.eup %1474 }
 0x209   :  { %1484 = vtanh.f32 %v714_v31 }
 0x20a   :  { %1486 = vtanh.f32 %v716_v58  ;;  %v719_v61 = vpop.f32.mrb[24].mxu1 }
 0x20b   :  { %v1477_v62 = vpop.eup %1476  ;;  %v720_v0 = vadd.f32 %v719_v61, %v2093_v47  ;;  %v721_v1 = vpop.f32.mrb[25].mxu1 }
 0x20c   :  { %v1479_v2 = vpop.eup %1478  ;;  %v722_v4 = vadd.f32 %v721_v1, %v2097_v48  ;;  %v1253_v5 = vpack.c.bf16 %v1477_v62, %v1473_v59 }
 0x20d   :  { %v1250_v6 = vpack.c.bf16 %v1479_v2, %v1475_v60  ;;  %1488 = vtanh.f32 %v720_v0 }
 0x20e   :  { %v725_v7 = vpop.f32.mrb[26].mxu1  ;;  %1490 = vtanh.f32 %v722_v4 }
 0x20f   :  { %v726_v8 = vadd.f32 %v725_v7, %v2093_v47  ;;  %v727_v10 = vpop.f32.mrb[27].mxu1  ;;  %1252 = vmatprep.subr.msk.bf16.mxu0 %vm2118_vm1, %v1250_v6  ;;  %v1481_v12 = vpop.eup %1480 }
 0x210   :  { %v728_v11 = vadd.f32 %v727_v10, %v2097_v48  ;;  %1254 = vmatpush1.bf16.xpose.msra.mxu0 %v1253_v5  ;;  %v1483_v13 = vpop.eup %1482 }
 0x211   :  { %1492 = vtanh.f32 %v726_v8 }
 0x212   :  { %1494 = vtanh.f32 %v728_v11  ;;  %v731_v14 = vpop.f32.mrb[28].mxu1 }
 0x213   :  { %v1485_v15 = vpop.eup %1484  ;;  %v732_v16 = vadd.f32 %v731_v14, %v2093_v47  ;;  %v733_v17 = vpop.f32.mrb[29].mxu1 }
 0x214   :  { %v1487_v18 = vpop.eup %1486  ;;  %v734_v19 = vadd.f32 %v733_v17, %v2097_v48  ;;  %v1258_v20 = vpack.c.bf16 %v1485_v15, %v1481_v12 }
 0x215   :  { %v1255_v21 = vpack.c.bf16 %v1487_v18, %v1483_v13  ;;  %1496 = vtanh.f32 %v732_v16 }
 0x216   :  { %v737_v22 = vpop.f32.mrb[30].mxu1  ;;  %1498 = vtanh.f32 %v734_v19 }
 0x217   :  { %v738_v23 = vadd.f32 %v737_v22, %v2093_v47  ;;  %v739_v24 = vpop.f32.mrb[31].mxu1  ;;  %1257 = vmatprep.subr.msk.bf16.mxu0 %vm2118_vm1, %v1255_v21  ;;  %v1489_v26 = vpop.eup %1488 }
 0x218   :  { %v740_v25 = vadd.f32 %v739_v24, %v2097_v48  ;;  %1259 = vmatpush1.bf16.xpose.msra.mxu0 %v1258_v20  ;;  %v1491_v27 = vpop.eup %1490 }
 0x219   :  { %1500 = vtanh.f32 %v738_v23 }
 0x21a   :  { %1502 = vtanh.f32 %v740_v25  ;;  %v743_v30 = vpop.f32.mrb[32].mxu1 }
 0x21b   :  { %v1493_v33 = vpop.eup %1492  ;;  %v744_v34 = vadd.f32 %v743_v30, %v2093_v47  ;;  %v745_v35 = vpop.f32.mrb[33].mxu1 }
 0x21c   :  { %v1495_v36 = vpop.eup %1494  ;;  %v746_v37 = vadd.f32 %v745_v35, %v2097_v48  ;;  %v1263_v38 = vpack.c.bf16 %v1493_v33, %v1489_v26 }
 0x21d   :  { %v1260_v39 = vpack.c.bf16 %v1495_v36, %v1491_v27  ;;  %1504 = vtanh.f32 %v744_v34 }
 0x21e   :  { %v749_v40 = vpop.f32.mrb[34].mxu1  ;;  %1506 = vtanh.f32 %v746_v37 }
 0x21f   :  { %v750_v41 = vadd.f32 %v749_v40, %v2093_v47  ;;  %v751_v42 = vpop.f32.mrb[35].mxu1  ;;  %1262 = vmatprep.subr.msk.bf16.mxu0 %vm2118_vm1, %v1260_v39  ;;  %v1497_v44 = vpop.eup %1496 }
 0x220   :  { %v752_v43 = vadd.f32 %v751_v42, %v2097_v48  ;;  %1264 = vmatpush1.bf16.xpose.msra.mxu0 %v1263_v38  ;;  %v1499_v45 = vpop.eup %1498 }
 0x221   :  { %1508 = vtanh.f32 %v750_v41 }
 0x222   :  { %1510 = vtanh.f32 %v752_v43  ;;  %v755_v32 = vpop.f32.mrb[36].mxu1 }
 0x223   :  { %v1501_v46 = vpop.eup %1500  ;;  %v756_v3 = vadd.f32 %v755_v32, %v2093_v47  ;;  %v757_v49 = vpop.f32.mrb[37].mxu1 }
 0x224   :  { %v1503_v50 = vpop.eup %1502  ;;  %v758_v51 = vadd.f32 %v757_v49, %v2097_v48  ;;  %v1268_v52 = vpack.c.bf16 %v1501_v46, %v1497_v44 }
 0x225   :  { %v1265_v53 = vpack.c.bf16 %v1503_v50, %v1499_v45  ;;  %1512 = vtanh.f32 %v756_v3 }
 0x226   :  { %v761_v54 = vpop.f32.mrb[38].mxu1  ;;  %1514 = vtanh.f32 %v758_v51 }
 0x227   :  { %v762_v55 = vadd.f32 %v761_v54, %v2093_v47  ;;  %v763_v56 = vpop.f32.mrb[39].mxu1  ;;  %1267 = vmatprep.subr.msk.bf16.mxu0 %vm2118_vm1, %v1265_v53  ;;  %v1505_v28 = vpop.eup %1504 }
 0x228   :  { %v764_v29 = vadd.f32 %v763_v56, %v2097_v48  ;;  %1269 = vmatpush1.bf16.xpose.msra.mxu0 %v1268_v52  ;;  %v1507_v31 = vpop.eup %1506 }
 0x229   :  { %1516 = vtanh.f32 %v762_v55 }
 0x22a   :  { %1518 = vtanh.f32 %v764_v29  ;;  %v767_v57 = vpop.f32.mrb[40].mxu1 }
 0x22b   :  { %v1509_v58 = vpop.eup %1508  ;;  %v768_v59 = vadd.f32 %v767_v57, %v2093_v47  ;;  %v769_v60 = vpop.f32.mrb[41].mxu1 }
 0x22c   :  { %v1511_v61 = vpop.eup %1510  ;;  %v770_v62 = vadd.f32 %v769_v60, %v2097_v48  ;;  %v1273_v0 = vpack.c.bf16 %v1509_v58, %v1505_v28 }
 0x22d   :  { %v1270_v1 = vpack.c.bf16 %v1511_v61, %v1507_v31  ;;  %1520 = vtanh.f32 %v768_v59 }
 0x22e   :  { %v773_v2 = vpop.f32.mrb[42].mxu1  ;;  %1522 = vtanh.f32 %v770_v62 }
 0x22f   :  { %v774_v4 = vadd.f32 %v773_v2, %v2093_v47  ;;  %v775_v5 = vpop.f32.mrb[43].mxu1  ;;  %1272 = vmatprep.subr.msk.bf16.mxu0 %vm2118_vm1, %v1270_v1  ;;  %v1513_v7 = vpop.eup %1512 }
 0x230   :  { %v776_v6 = vadd.f32 %v775_v5, %v2097_v48  ;;  %1274 = vmatpush1.bf16.xpose.msra.mxu0 %v1273_v0  ;;  %v1515_v8 = vpop.eup %1514 }
 0x231   :  { %1524 = vtanh.f32 %v774_v4 }
 0x232   :  { %1526 = vtanh.f32 %v776_v6  ;;  %v779_v10 = vpop.f32.mrb[44].mxu1 }
 0x233   :  { %v1517_v11 = vpop.eup %1516  ;;  %v780_v12 = vadd.f32 %v779_v10, %v2093_v47  ;;  %v781_v13 = vpop.f32.mrb[45].mxu1 }
 0x234   :  { %v1519_v14 = vpop.eup %1518  ;;  %v782_v15 = vadd.f32 %v781_v13, %v2097_v48  ;;  %v1278_v16 = vpack.c.bf16 %v1517_v11, %v1513_v7 }
 0x235   :  { %v1275_v17 = vpack.c.bf16 %v1519_v14, %v1515_v8  ;;  %1528 = vtanh.f32 %v780_v12 }
 0x236   :  { %v785_v18 = vpop.f32.mrb[46].mxu1  ;;  %1530 = vtanh.f32 %v782_v15 }
 0x237   :  { %v786_v19 = vadd.f32 %v785_v18, %v2093_v47  ;;  %v787_v20 = vpop.f32.mrb[47].mxu1  ;;  %1277 = vmatprep.subr.msk.bf16.mxu0 %vm2118_vm1, %v1275_v17  ;;  %v1521_v22 = vpop.eup %1520 }
 0x238   :  { %v788_v21 = vadd.f32 %v787_v20, %v2097_v48  ;;  %1279 = vmatpush1.bf16.xpose.msra.mxu0 %v1278_v16  ;;  %v1523_v23 = vpop.eup %1522 }
 0x239   :  { %1532 = vtanh.f32 %v786_v19 }
 0x23a   :  { %1534 = vtanh.f32 %v788_v21  ;;  %v791_v24 = vpop.f32.mrb[48].mxu1 }
 0x23b   :  { %v1525_v25 = vpop.eup %1524  ;;  %v792_v26 = vadd.f32 %v791_v24, %v2093_v47  ;;  %v793_v27 = vpop.f32.mrb[49].mxu1 }
 0x23c   :  { %v1527_v30 = vpop.eup %1526  ;;  %v794_v33 = vadd.f32 %v793_v27, %v2097_v48  ;;  %v1283_v34 = vpack.c.bf16 %v1525_v25, %v1521_v22 }
 0x23d   :  { %v1280_v35 = vpack.c.bf16 %v1527_v30, %v1523_v23  ;;  %1536 = vtanh.f32 %v792_v26 }
 0x23e   :  { %v797_v36 = vpop.f32.mrb[50].mxu1  ;;  %1538 = vtanh.f32 %v794_v33 }
 0x23f   :  { %v798_v37 = vadd.f32 %v797_v36, %v2093_v47  ;;  %v799_v38 = vpop.f32.mrb[51].mxu1  ;;  %1282 = vmatprep.subr.msk.bf16.mxu0 %vm2118_vm1, %v1280_v35  ;;  %v1529_v40 = vpop.eup %1528 }
 0x240   :  { %v800_v39 = vadd.f32 %v799_v38, %v2097_v48  ;;  %1284 = vmatpush1.bf16.xpose.msra.mxu0 %v1283_v34  ;;  %v1531_v41 = vpop.eup %1530 }
 0x241   :  { %1540 = vtanh.f32 %v798_v37 }
 0x242   :  { %1542 = vtanh.f32 %v800_v39  ;;  %v803_v42 = vpop.f32.mrb[52].mxu1 }
 0x243   :  { %v1533_v43 = vpop.eup %1532  ;;  %v804_v44 = vadd.f32 %v803_v42, %v2093_v47  ;;  %v805_v45 = vpop.f32.mrb[53].mxu1 }
 0x244   :  { %v1535_v32 = vpop.eup %1534  ;;  %v806_v46 = vadd.f32 %v805_v45, %v2097_v48  ;;  %v1288_v3 = vpack.c.bf16 %v1533_v43, %v1529_v40 }
 0x245   :  { %v1285_v49 = vpack.c.bf16 %v1535_v32, %v1531_v41  ;;  %1544 = vtanh.f32 %v804_v44 }
 0x246   :  { %v809_v50 = vpop.f32.mrb[54].mxu1  ;;  %1546 = vtanh.f32 %v806_v46 }
 0x247   :  { %v810_v51 = vadd.f32 %v809_v50, %v2093_v47  ;;  %v811_v52 = vpop.f32.mrb[55].mxu1  ;;  %1287 = vmatprep.subr.msk.bf16.mxu0 %vm2118_vm1, %v1285_v49  ;;  %v1537_v54 = vpop.eup %1536 }
 0x248   :  { %v812_v53 = vadd.f32 %v811_v52, %v2097_v48  ;;  %1289 = vmatpush1.bf16.xpose.msra.mxu0 %v1288_v3  ;;  %v1539_v55 = vpop.eup %1538 }
 0x249   :  { %1548 = vtanh.f32 %v810_v51 }
 0x24a   :  { %1550 = vtanh.f32 %v812_v53  ;;  %v815_v56 = vpop.f32.mrb[56].mxu1 }
 0x24b   :  { %v1541_v29 = vpop.eup %1540  ;;  %v816_v28 = vadd.f32 %v815_v56, %v2093_v47  ;;  %v817_v31 = vpop.f32.mrb[57].mxu1 }
 0x24c   :  { %v1543_v57 = vpop.eup %1542  ;;  %v818_v58 = vadd.f32 %v817_v31, %v2097_v48  ;;  %v1293_v59 = vpack.c.bf16 %v1541_v29, %v1537_v54 }
 0x24d   :  { %v1290_v60 = vpack.c.bf16 %v1543_v57, %v1539_v55  ;;  %1552 = vtanh.f32 %v816_v28 }
 0x24e   :  { %v821_v61 = vpop.f32.mrb[58].mxu1  ;;  %1554 = vtanh.f32 %v818_v58 }
 0x24f   :  { %v822_v62 = vadd.f32 %v821_v61, %v2093_v47  ;;  %v823_v0 = vpop.f32.mrb[59].mxu1  ;;  %1292 = vmatprep.subr.msk.bf16.mxu0 %vm2118_vm1, %v1290_v60  ;;  %v1545_v2 = vpop.eup %1544 }
 0x250   :  { %v824_v1 = vadd.f32 %v823_v0, %v2097_v48  ;;  %1294 = vmatpush1.bf16.xpose.msra.mxu0 %v1293_v59  ;;  %v1547_v4 = vpop.eup %1546 }
 0x251   :  { %1556 = vtanh.f32 %v822_v62 }
 0x252   :  { %1558 = vtanh.f32 %v824_v1  ;;  %v827_v5 = vpop.f32.mrb[60].mxu1 }
 0x253   :  { %v1549_v6 = vpop.eup %1548  ;;  %v828_v7 = vadd.f32 %v827_v5, %v2093_v47  ;;  %v829_v8 = vpop.f32.mrb[61].mxu1 }
 0x254   :  { %v1551_v10 = vpop.eup %1550  ;;  %v830_v11 = vadd.f32 %v829_v8, %v2097_v48  ;;  %v1298_v12 = vpack.c.bf16 %v1549_v6, %v1545_v2 }
 0x255   :  { %v1295_v13 = vpack.c.bf16 %v1551_v10, %v1547_v4  ;;  %1560 = vtanh.f32 %v828_v7 }
 0x256   :  { %v833_v14 = vpop.f32.mrb[62].mxu1  ;;  %1562 = vtanh.f32 %v830_v11 }
 0x257   :  { %v834_v15 = vadd.f32 %v833_v14, %v2093_v47  ;;  %v835_v16 = vpop.f32.mrb[63].mxu1  ;;  %1297 = vmatprep.subr.msk.bf16.mxu0 %vm2118_vm1, %v1295_v13  ;;  %v1553_v18 = vpop.eup %1552 }
 0x258   :  { %v836_v17 = vadd.f32 %v835_v16, %v2097_v48  ;;  %1299 = vmatpush1.bf16.xpose.msra.mxu0 %v1298_v12  ;;  %v1555_v19 = vpop.eup %1554  ;;  %v904_v48 = vstv %s2222_s6 }
 0x259   :  { %1564 = vtanh.f32 %v834_v15 }
 0x25a   :  { %1566 = vtanh.f32 %v836_v17 }
 0x25b   :  { %v1557_v20 = vpop.eup %1556 }
 0x25c   :  { %v1559_v21 = vpop.eup %1558  ;;  %v1303_v22 = vpack.c.bf16 %v1557_v20, %v1553_v18 }
 0x25d   :  { %v1300_v23 = vpack.c.bf16 %v1559_v21, %v1555_v19 }
 0x25f   :  { %1302 = vmatprep.subr.msk.bf16.mxu0 %vm2118_vm1, %v1300_v23  ;;  %v1561_v47 = vpop.eup %1560 }
 0x260   :  { %1304 = vmatpush1.bf16.xpose.msra.mxu0 %v1303_v22  ;;  %v1563_v24 = vpop.eup %1562 }
 0x263   :  { %v1565_v25 = vpop.eup %1564 }
 0x264   :  { %v1567_v26 = vpop.eup %1566  ;;  %v1308_v27 = vpack.c.bf16 %v1565_v25, %v1561_v47 }
 0x265   :  { %v1305_v30 = vpack.c.bf16 %v1567_v26, %v1563_v24 }
 0x267   :  { %1307 = vmatprep.subr.msk.bf16.mxu0 %vm2118_vm1, %v1305_v30 }
 0x268   :  { %1309 = vmatpush1.bf16.xpose.msra.mxu0 %v1308_v27 }
 0x26f   :  { %1070 = vmatmul.mubr.f32.vlgmr.msra.gmra.mrb[64].mxu0 %v2110_v63 }
 0x342   :  { %v1071_v33 = vpop.f32.mrb[64].mxu0 }
 0x343   :  { %v1072_v34 = vadd.f32 %v1071_v33, %v904_v48  ;;  %v1073_v35 = vpop.f32.mrb[65].mxu0 }
 0x344   :  { %v1074_v36 = vadd.f32 %v1073_v35, %v904_v48 }
 0x346   :  { %v1078_v37 = vcombine.low %v1072_v34, %v1074_v36 }
 0x348   :  { %1080 = vst [vmem:[%s2223_s7] sm:$0xff] %v1078_v37 }

</bundles_post_ra>
